<compile_context>
chip_gen: v6e
topology: v6e:2x2x1
jax: 0.10.0
libtpu: 0.0.40
codegen_flags: <defaults>
</compile_context>

<pallas_src>
import functools

import jax
import jax.numpy as jnp
from jax.experimental import pallas as pl
from jax.experimental.pallas import tpu as pltpu


def _layernorm_f32(x, gamma, beta, eps=1e-5):
    xf = x.astype(jnp.float32)
    mean = jnp.mean(xf, axis=-1, keepdims=True)
    var = jnp.mean((xf - mean) ** 2, axis=-1, keepdims=True)
    xhat = (xf - mean) * jax.lax.rsqrt(var + eps)
    return xhat * gamma.astype(jnp.float32) + beta.astype(jnp.float32)


# ---------------------------------------------------------------------------
# kernel 1: pre_norm + K/V projections, lane-dense (B, N, D) outputs
# ---------------------------------------------------------------------------
def kv_kernel(x_ref, g_ref, b_ref, wqkv_ref, k_ref, v_ref):
    D = x_ref.shape[-1]
    xn = _layernorm_f32(x_ref[0], g_ref[0], b_ref[0]).astype(wqkv_ref.dtype)
    # fused wqkv stays fused in HBM; the K / V column panels are static,
    # lane-aligned (at production D) slices of the VMEM-resident weight block.
    k_ref[0] = jnp.dot(xn, wqkv_ref[:, D:2 * D],
                       preferred_element_type=jnp.float32).astype(k_ref.dtype)
    v_ref[0] = jnp.dot(xn, wqkv_ref[:, 2 * D:3 * D],
                       preferred_element_type=jnp.float32).astype(v_ref.dtype)


# ---------------------------------------------------------------------------
# kernel 2: fused Q + flash attention (kv-tiled online softmax) + proj + norm1
#           + F-chunked GELU MLP
# ---------------------------------------------------------------------------
def attn_ffn_kernel(x_ref, k_ref, v_ref,
                    gpre_ref, bpre_ref, wqkv_ref,
                    wproj_ref, bproj_ref, g1_ref, beta1_ref,
                    w1_ref, b1_ref, w2_ref, b2_ref,
                    o_ref, q_scr, m_scr, l_scr, acc_scr,
                    *, num_heads, head_dim, scale, ffn_chunk, approx_gelu):
    ki = pl.program_id(2)
    H, hd = num_heads, head_dim
    D = x_ref.shape[-1]
    cdt = wqkv_ref.dtype                                 # matmul operand dtype

    @pl.when(ki == 0)
    def _():
        # pre_norm + Q projection fused here: q never round-trips through HBM.
        xn = _layernorm_f32(x_ref[0], gpre_ref[0], bpre_ref[0]).astype(cdt)
        q = jnp.dot(xn, wqkv_ref[:, :D], preferred_element_type=jnp.float32)
        q_scr[...] = (q * scale).astype(q_scr.dtype)     # fold softmax scale in
        m_scr[...] = jnp.full(m_scr.shape, -jnp.inf, dtype=m_scr.dtype)
        l_scr[...] = jnp.zeros(l_scr.shape, dtype=l_scr.dtype)
        acc_scr[...] = jnp.zeros(acc_scr.shape, dtype=acc_scr.dtype)

    # Online softmax over this kv tile.  head_dim caps the MXU contraction depth
    # whether or not heads are batched, so the static per-head unroll costs the
    # same MXU work as a batched einsum while reading lane-dense K/V blocks.
    for h in range(H):
        lo, hi = h * hd, (h + 1) * hd
        qh = q_scr[:, lo:hi]                             # (tq, hd), pre-scaled
        kh = k_ref[0, :, lo:hi]                          # (tk, hd)
        s = jax.lax.dot_general(qh, kh, (((1,), (1,)), ((), ())),
                                preferred_element_type=jnp.float32)  # (tq, tk)
        m_prev = m_scr[h]
        m_new = jnp.maximum(m_prev, jnp.max(s, axis=-1, keepdims=True))
        alpha = jnp.exp(m_prev - m_new)
        p = jnp.exp(s - m_new)
        l_scr[h] = alpha * l_scr[h] + jnp.sum(p, axis=-1, keepdims=True)
        vh = v_ref[0, :, lo:hi]                          # (tk, hd)
        acc_scr[h] = alpha * acc_scr[h] + jnp.dot(
            p.astype(vh.dtype), vh, preferred_element_type=jnp.float32)
        m_scr[h] = m_new

    @pl.when(ki == pl.num_programs(2) - 1)
    def _():
        x = x_ref[0].astype(jnp.float32)
        # softmax normalization via EUP approx reciprocal instead of a VPU divide
        inv_l = pl.reciprocal(l_scr[...], approx=True)              # (H, tq, 1)
        # merge heads once per q tile -> (tq, D) so the output projection is a
        # single lane-/K-dense matmul.
        attn = jnp.concatenate(
            [acc_scr[h] * inv_l[h] for h in range(H)], axis=-1)

        attn = jnp.dot(attn.astype(cdt), wproj_ref[...],
                       preferred_element_type=jnp.float32)
        attn = attn + bproj_ref[0].astype(jnp.float32)

        src = x + attn                                              # residual 1
        src = _layernorm_f32(src, g1_ref[0], beta1_ref[0])          # norm1
        src_c = src.astype(cdt)

        # FFN tiled over the feedforward dim: the full (tq, F) hidden activation
        # is never live at once -- each chunk is matmul'd, GELU'd and folded into
        # a f32 (tq, D) accumulator immediately.
        F = w1_ref.shape[1]
        ffn = jnp.zeros(src.shape, jnp.float32)
        for f0 in range(0, F, ffn_chunk):
            f1 = f0 + ffn_chunk
            h1 = jnp.dot(src_c, w1_ref[:, f0:f1],
                         preferred_element_type=jnp.float32)
            h1 = h1 + b1_ref[:, f0:f1].astype(jnp.float32)
            # exact erf GELU matches F.gelu; approximate=True (tanh form, rides
            # the EUP) is cheaper but numerically different -- opt-in only.
            h1 = jax.nn.gelu(h1, approximate=approx_gelu)
            ffn = ffn + jnp.dot(h1.astype(cdt), w2_ref[f0:f1, :],
                                preferred_element_type=jnp.float32)
        ffn = ffn + b2_ref[0].astype(jnp.float32)

        o_ref[0] = (src + ffn).astype(o_ref.dtype)                  # residual 2


# ---------------------------------------------------------------------------
# wrapper
# ---------------------------------------------------------------------------
def _pick_tile(n, target):
    """Largest multiple-of-8 divisor of n that is <= target, else n (full dim)."""
    if n <= target:
        return n
    t = (min(target, n) // 8) * 8
    while t >= 8:
        if n % t == 0:
            return t
        t -= 8
    return n


def _ffn_chunk(f, target=512):
    """Largest multiple-of-128 divisor of f that is <= target, else f itself."""
    if f <= target:
        return f
    c = (target // 128) * 128
    while c >= 128:
        if f % c == 0:
            return c
        c -= 128
    return f


def _vmem_budget():
    """~75% of per-core physical VMEM; conservative 48 MiB fallback (v7x-safe)."""
    try:
        cap = getattr(pltpu.get_tpu_info(), "vmem_capacity_bytes", None)
    except Exception:   # best-effort hardware query only
        cap = None
    if not cap:
        return 48 * 1024 * 1024
    return int(cap) * 3 // 4


def transformer_encoder(x, params, *, num_heads, q_tile=None, kv_tile=None,
                        approx_gelu=False):
    B, N, D = x.shape
    F = params["w1"].shape[1]
    head_dim = D // num_heads
    assert num_heads * head_dim == D
    H = num_heads

    vmem_limit = _vmem_budget()
    big_vmem = vmem_limit >= (80 << 20)            # v5e / v6e (128 MiB physical)
    if q_tile is None:
        q_tile = 512 if big_vmem else 256          # v7x: smaller tiles, 64 MiB VMEM
    if kv_tile is None:
        kv_tile = 512 if big_vmem else 256

    # TODO(synk): for ragged ViT lengths (e.g. N=197) pad N to a tile multiple and
    # mask padded keys in the online softmax instead of this full-N fallback.
    tq = _pick_tile(N, q_tile)
    tk = _pick_tile(N, kv_tile)
    # keep the megacore 'parallel' grid extent >= 2 when it costs nothing (v7x: 2 TCs)
    if B * (N // tq) == 1:
        tq = _pick_tile(N, max(8, tq // 2))
    nq, nk = N // tq, N // tk

    dtype = x.dtype
    itemsize = jnp.dtype(dtype).itemsize
    w_itemsize = jnp.dtype(params["wqkv"].dtype).itemsize
    fc = _ffn_chunk(F)

    # Constant (grid-invariant) blocks: single-buffered -> no double-buffer waste.
    def const2(shape):
        return pl.BlockSpec(shape, lambda b, i: (0,) * len(shape),
                            pipeline_mode=pl.Buffered(1))

    def const3(shape):
        return pl.BlockSpec(shape, lambda b, i, j: (0,) * len(shape),
                            pipeline_mode=pl.Buffered(1))

    # -------------------- kernel 1: pre_norm + K/V --------------------
    kv_out = jax.ShapeDtypeStruct((B, N, D), dtype)
    kv_cost = pl.CostEstimate(
        flops=int(2 * B * N * 2 * D * D),
        transcendentals=int(B * N),
        bytes_accessed=int(3 * B * N * D * itemsize
                           + (3 * D * D + 2 * D) * w_itemsize))

    k, v = pl.pallas_call(
        kv_kernel,
        out_shape=(kv_out, kv_out),
        grid=(B, nq),
        in_specs=[
            pl.BlockSpec((1, tq, D), lambda b, i: (b, i, 0)),      # x
            const2((1, D)), const2((1, D)),                        # pre_norm g, b
            const2((D, 3 * D)),                                    # fused wqkv
        ],
        out_specs=[pl.BlockSpec((1, tq, D), lambda b, i: (b, i, 0))
                   for _ in range(2)],
        compiler_params=pltpu.CompilerParams(
            dimension_semantics=("parallel", "parallel"),
            vmem_limit_bytes=vmem_limit),
        cost_estimate=kv_cost,
    )(x, params["g_pre"], params["b_pre"], params["wqkv"])

    # ------------- kernel 2: Q + attention + proj + norm1 + MLP -------------
    attn_cost = pl.CostEstimate(
        flops=int(2 * B * N * (2 * N * D + 2 * D * D + 2 * D * F)),
        transcendentals=int(B * H * N * N + B * N * F),
        bytes_accessed=int((2 + 2 * nq) * B * N * D * itemsize
                           + (4 * D * D + 2 * D * F + 4 * D + F) * w_itemsize))

    out = pl.pallas_call(
        functools.partial(attn_ffn_kernel, num_heads=H, head_dim=head_dim,
                          scale=head_dim ** -0.5, ffn_chunk=fc,
                          approx_gelu=approx_gelu),
        out_shape=jax.ShapeDtypeStruct((B, N, D), dtype),
        grid=(B, nq, nk),
        in_specs=[
            pl.BlockSpec((1, tq, D), lambda b, i, j: (b, i, 0)),   # x
            pl.BlockSpec((1, tk, D), lambda b, i, j: (b, j, 0)),   # k (lane-dense)
            pl.BlockSpec((1, tk, D), lambda b, i, j: (b, j, 0)),   # v (lane-dense)
            const3((1, D)),       # pre_norm gamma (fused Q path)
            const3((1, D)),       # pre_norm beta
            const3((D, 3 * D)),   # fused wqkv (only the Q columns are read)
            const3((D, D)),       # wproj
            const3((1, D)),       # bproj
            const3((1, D)),       # norm1 gamma
            const3((1, D)),       # norm1 beta
            const3((D, F)),       # linear1 weight
            const3((1, F)),       # linear1 bias
            const3((F, D)),       # linear2 weight
            const3((1, D)),       # linear2 bias
        ],
        out_specs=pl.BlockSpec((1, tq, D), lambda b, i, j: (b, i, 0)),
        scratch_shapes=[
            pltpu.VMEM((tq, D), dtype),                   # pre-scaled q, per q-tile
            pltpu.VMEM((H, tq, 1), jnp.float32),          # running max
            pltpu.VMEM((H, tq, 1), jnp.float32),          # running denominator
            pltpu.VMEM((H, tq, head_dim), jnp.float32),   # running numerator
        ],
        compiler_params=pltpu.CompilerParams(
            dimension_semantics=("parallel", "parallel", "arbitrary"),
            vmem_limit_bytes=vmem_limit),
        cost_estimate=attn_cost,
    )(x, k, v,
      params["g_pre"], params["b_pre"], params["wqkv"],
      params["wproj"], params["bproj"], params["g1"], params["beta1"],
      params["w1"], params["b1"], params["w2"], params["b2"])
    return out


# ---------------------------------------------------------------------------
# pure-JAX reference (eval-mode forward of the PyTorch module)
# ---------------------------------------------------------------------------
def reference(x, params, *, num_heads):
    B, N, D = x.shape
    hd = D // num_heads
    xn = _layernorm_f32(x, params["g_pre"][0], params["b_pre"][0])
    qkv = xn @ params["wqkv"]
    q, k, v = qkv[..., :D], qkv[..., D:2 * D], qkv[..., 2 * D:]
    q = q.reshape(B, N, num_heads, hd).transpose(0, 2, 1, 3)
    k = k.reshape(B, N, num_heads, hd).transpose(0, 2, 1, 3)
    v = v.reshape(B, N, num_heads, hd).transpose(0, 2, 1, 3)
    s = jnp.einsum("bhqd,bhkd->bhqk", q, k) * (hd ** -0.5)
    p = jax.nn.softmax(s, axis=-1)
    a = jnp.einsum("bhqk,bhkd->bhqd", p, v).transpose(0, 2, 1, 3).reshape(B, N, D)
    a = a @ params["wproj"] + params["bproj"][0]
    src = x + a
    src = _layernorm_f32(src, params["g1"][0], params["beta1"][0])
    h1 = jax.nn.gelu(src @ params["w1"] + params["b1"][0], approximate=False)
    h2 = h1 @ params["w2"] + params["b2"][0]
    return src + h2


def init_params(key, d_model, dim_feedforward):
    keys = jax.random.split(key, 6)
    std = 0.02
    return {
        "g_pre": jnp.ones((1, d_model), jnp.float32),
        "b_pre": jnp.zeros((1, d_model), jnp.float32),
        "wqkv": std * jax.random.normal(keys[0], (d_model, 3 * d_model), jnp.float32),
        "wproj": std * jax.random.normal(keys[1], (d_model, d_model), jnp.float32),
        "bproj": std * jax.random.normal(keys[2], (1, d_model), jnp.float32),
        "g1": jnp.ones((1, d_model), jnp.float32),
        "beta1": jnp.zeros((1, d_model), jnp.float32),
        "w1": std * jax.random.normal(keys[3], (d_model, dim_feedforward), jnp.float32),
        "b1": std * jax.random.normal(keys[4], (1, dim_feedforward), jnp.float32),
        "w2": std * jax.random.normal(keys[5], (dim_feedforward, d_model), jnp.float32),
        "b2": jnp.zeros((1, d_model), jnp.float32),
    }


if __name__ == "__main__":
    B, N, d_model, nhead, dim_ff = 2, 8, 32, 4, 64

    key = jax.random.PRNGKey(0)
    kx, kp = jax.random.split(key)
    x = jax.random.normal(kx, (B, N, d_model), jnp.float32)
    params = init_params(kp, d_model, dim_ff)

    out = transformer_encoder(x, params, num_heads=nhead)
    out = jax.block_until_ready(out)

    ref = reference(x, params, num_heads=nhead)
    assert out.shape == (B, N, d_model)
    # pl.reciprocal(approx=True) in the softmax normalization introduces ~1e-4
    # relative error vs. the exact-division reference; everything else is f32.
    err = float(jnp.max(jnp.abs(out - ref)))
    assert jnp.allclose(out, ref, atol=2e-3, rtol=2e-3), err

    print("KERNEL_OK")
</pallas_src>

<mosaic_0001>
module attributes {stable_mosaic.version = 11 : i64} {
  func.func @kv_kernel(%arg0: i32, %arg1: i32, %arg2: memref<1x8x32xf32, #tpu.memory_space<vmem>>, %arg3: memref<1x32xf32, #tpu.memory_space<vmem>>, %arg4: memref<1x32xf32, #tpu.memory_space<vmem>>, %arg5: memref<32x96xf32, #tpu.memory_space<vmem>>, %arg6: memref<1x8x32xf32, #tpu.memory_space<vmem>>, %arg7: memref<1x8x32xf32, #tpu.memory_space<vmem>>) attributes {dimension_semantics = [#tpu.dimension_semantics<parallel>, #tpu.dimension_semantics<parallel>], iteration_bounds = array<i64: 2, 1>, scalar_prefetch = 0 : i64, scratch_operands = 0 : i64, tpu.core_type = #tpu.core_type<tc>, window_params = [{transform_indices = @transform_0, window_bounds = array<i64: 1, 8, 32>}, {pipeline_mode = #tpu.pipeline_mode<synchronous>, transform_indices = @transform_1, window_bounds = array<i64: 1, 32>}, {pipeline_mode = #tpu.pipeline_mode<synchronous>, transform_indices = @transform_2, window_bounds = array<i64: 1, 32>}, {pipeline_mode = #tpu.pipeline_mode<synchronous>, transform_indices = @transform_3, window_bounds = array<i64: 32, 96>}, {transform_indices = @transform_4, window_bounds = array<i64: 1, 8, 32>}, {transform_indices = @transform_5, window_bounds = array<i64: 1, 8, 32>}]} {
    %c0 = arith.constant 0 : index
    %c0_0 = arith.constant 0 : index
    %c0_1 = arith.constant 0 : index
    %0 = vector.load %arg2[%c0, %c0_0, %c0_1] : memref<1x8x32xf32, #tpu.memory_space<vmem>>, vector<1x8x32xf32>
    %1 = vector.shape_cast %0 : vector<1x8x32xf32> to vector<8x32xf32>
    %c0_2 = arith.constant 0 : index
    %c0_3 = arith.constant 0 : index
    %2 = vector.load %arg3[%c0_2, %c0_3] : memref<1x32xf32, #tpu.memory_space<vmem>>, vector<1x32xf32>
    %3 = vector.shape_cast %2 : vector<1x32xf32> to vector<32xf32>
    %c0_4 = arith.constant 0 : index
    %c0_5 = arith.constant 0 : index
    %4 = vector.load %arg4[%c0_4, %c0_5] : memref<1x32xf32, #tpu.memory_space<vmem>>, vector<1x32xf32>
    %5 = vector.shape_cast %4 : vector<1x32xf32> to vector<32xf32>
    %cst = arith.constant dense<0.000000e+00> : vector<8xf32>
    %6 = vector.multi_reduction <add>, %1, %cst [1] : vector<8x32xf32> to vector<8xf32>
    %7 = vector.shape_cast %6 : vector<8xf32> to vector<8x1xf32>
    %cst_6 = arith.constant 3.200000e+01 : f32
    %8 = vector.broadcast %cst_6 : f32 to vector<8x1xf32>
    %9 = arith.divf %7, %8 : vector<8x1xf32>
    %10 = vector.broadcast %9 : vector<8x1xf32> to vector<8x32xf32>
    %11 = arith.subf %1, %10 : vector<8x32xf32>
    %12 = arith.mulf %11, %11 : vector<8x32xf32>
    %cst_7 = arith.constant dense<0.000000e+00> : vector<8xf32>
    %13 = vector.multi_reduction <add>, %12, %cst_7 [1] : vector<8x32xf32> to vector<8xf32>
    %14 = vector.shape_cast %13 : vector<8xf32> to vector<8x1xf32>
    %cst_8 = arith.constant 3.200000e+01 : f32
    %15 = vector.broadcast %cst_8 : f32 to vector<8x1xf32>
    %16 = arith.divf %14, %15 : vector<8x1xf32>
    %17 = vector.broadcast %9 : vector<8x1xf32> to vector<8x32xf32>
    %18 = arith.subf %1, %17 : vector<8x32xf32>
    %cst_9 = arith.constant 9.99999974E-6 : f32
    %19 = vector.broadcast %cst_9 : f32 to vector<8x1xf32>
    %20 = arith.addf %16, %19 : vector<8x1xf32>
    %21 = math.rsqrt %20 : vector<8x1xf32>
    %22 = vector.broadcast %21 : vector<8x1xf32> to vector<8x32xf32>
    %23 = arith.mulf %18, %22 : vector<8x32xf32>
    %24 = vector.shape_cast %3 : vector<32xf32> to vector<1x32xf32>
    %25 = vector.broadcast %24 : vector<1x32xf32> to vector<8x32xf32>
    %26 = arith.mulf %23, %25 : vector<8x32xf32>
    %27 = vector.shape_cast %5 : vector<32xf32> to vector<1x32xf32>
    %28 = vector.broadcast %27 : vector<1x32xf32> to vector<8x32xf32>
    %29 = arith.addf %26, %28 : vector<8x32xf32>
    %c0_10 = arith.constant 0 : index
    %c32 = arith.constant 32 : index
    %30 = vector.load %arg5[%c0_10, %c32] : memref<32x96xf32, #tpu.memory_space<vmem>>, vector<32x32xf32>
    %cst_11 = arith.constant dense<0.000000e+00> : vector<8x32xf32>
    %31 = tpu.matmul %29, %30, %cst_11 {dimension_numbers = #tpu.dot_dimension_numbers<[1], [0], [0], [1], [0, 0, 1, 1], [], []>} : vector<8x32xf32>, vector<32x32xf32>, vector<8x32xf32> -> vector<8x32xf32>
    %c0_12 = arith.constant 0 : index
    %c0_13 = arith.constant 0 : index
    %c0_14 = arith.constant 0 : index
    %32 = vector.load %arg6[%c0_12, %c0_13, %c0_14] : memref<1x8x32xf32, #tpu.memory_space<vmem>>, vector<1x8x32xf32>
    %33 = vector.shape_cast %32 : vector<1x8x32xf32> to vector<8x32xf32>
    %34 = vector.shape_cast %31 : vector<8x32xf32> to vector<1x8x32xf32>
    tpu.vector_store %arg6[%c0_12, %c0_13, %c0_14], %34 {strides = array<i32>} : memref<1x8x32xf32, #tpu.memory_space<vmem>>, vector<1x8x32xf32>,
    %c0_15 = arith.constant 0 : index
    %c64 = arith.constant 64 : index
    %35 = vector.load %arg5[%c0_15, %c64] : memref<32x96xf32, #tpu.memory_space<vmem>>, vector<32x32xf32>
    %cst_16 = arith.constant dense<0.000000e+00> : vector<8x32xf32>
    %36 = tpu.matmul %29, %35, %cst_16 {dimension_numbers = #tpu.dot_dimension_numbers<[1], [0], [0], [1], [0, 0, 1, 1], [], []>} : vector<8x32xf32>, vector<32x32xf32>, vector<8x32xf32> -> vector<8x32xf32>
    %c0_17 = arith.constant 0 : index
    %c0_18 = arith.constant 0 : index
    %c0_19 = arith.constant 0 : index
    %37 = vector.load %arg7[%c0_17, %c0_18, %c0_19] : memref<1x8x32xf32, #tpu.memory_space<vmem>>, vector<1x8x32xf32>
    %38 = vector.shape_cast %37 : vector<1x8x32xf32> to vector<8x32xf32>
    %39 = vector.shape_cast %36 : vector<8x32xf32> to vector<1x8x32xf32>
    tpu.vector_store %arg7[%c0_17, %c0_18, %c0_19], %39 {strides = array<i32>} : memref<1x8x32xf32, #tpu.memory_space<vmem>>, vector<1x8x32xf32>,
    return
  }
  func.func @transform_0(%arg0: i32, %arg1: i32) -> (i32, i32, i32) {
    %c0_i32 = arith.constant 0 : i32
    %c0_i32_0 = arith.constant 0 : i32
    return %arg0, %arg1, %c0_i32 : i32, i32, i32
  }
  func.func @transform_1(%arg0: i32, %arg1: i32) -> (i32, i32) {
    %c0_i32 = arith.constant 0 : i32
    %c0_i32_0 = arith.constant 0 : i32
    %c0_i32_1 = arith.constant 0 : i32
    return %c0_i32, %c0_i32_0 : i32, i32
  }
  func.func @transform_2(%arg0: i32, %arg1: i32) -> (i32, i32) {
    %c0_i32 = arith.constant 0 : i32
    %c0_i32_0 = arith.constant 0 : i32
    %c0_i32_1 = arith.constant 0 : i32
    return %c0_i32, %c0_i32_0 : i32, i32
  }
  func.func @transform_3(%arg0: i32, %arg1: i32) -> (i32, i32) {
    %c0_i32 = arith.constant 0 : i32
    %c0_i32_0 = arith.constant 0 : i32
    %c0_i32_1 = arith.constant 0 : i32
    return %c0_i32, %c0_i32_0 : i32, i32
  }
  func.func @transform_4(%arg0: i32, %arg1: i32) -> (i32, i32, i32) {
    %c0_i32 = arith.constant 0 : i32
    %c0_i32_0 = arith.constant 0 : i32
    return %arg0, %arg1, %c0_i32 : i32, i32, i32
  }
  func.func @transform_5(%arg0: i32, %arg1: i32) -> (i32, i32, i32) {
    %c0_i32 = arith.constant 0 : i32
    %c0_i32_0 = arith.constant 0 : i32
    return %arg0, %arg1, %c0_i32 : i32, i32, i32
  }
}

</mosaic_0001>

<bundles_post_ra>
// kernel: tpu_custom_call.1
= control target key start
LH: loop header
LB: loop body
LE: loop exit
PB: predicated region body
PF: predicated region fallthrough
CT: control target
= control target key end

     0   :  { %s1237_s0 = inlined_call_operand.hbm [shape: f32[2,8,32], index: 0, kind: input, shape index: {}]   ;;  %s1238_s1 = inlined_call_operand.vmem [shape: f32[1,32], index: 1, kind: input, shape index: {}]   ;;  %s1239_s2 = inlined_call_operand.vmem [shape: f32[1,32], index: 2, kind: input, shape index: {}]   ;;  %s1240_s3 = inlined_call_operand.hbm [shape: f32[32,96], index: 3, kind: input, shape index: {}]   ;;  %s1241_s4 = inlined_call_operand.hbm [shape: f32[2,8,32], index: 4, kind: output, shape index: {0}]   ;;  %s1242_s5 = inlined_call_operand.hbm [shape: f32[2,8,32], index: 5, kind: output, shape index: {1}]  }
   0x1   :  { %1245 = sst [smem:[#allocation15_spill]] %s1240_s3 }
   0x2   :  { %11 = vsyncpa [#allocation3], 0 }
   0x3   :  { %13 = vsyncpa [#allocation3 + $0x1], 0 }
   0x4   :  { %14 = vsyncpa [#allocation6], 0 }
   0x5   :  { %15 = vsyncpa [#allocation4], 0 }
   0x6   :  { %17 = vsyncpa [#allocation4 + $0x1], 0 }
   0x7   :  { %18 = vsyncpa [#allocation9], 0 }
   0x8   :  { %20 = vsyncpa [#allocation9 + $0x1], 0  ;;  %s1009_s18 = smov 0   ;;  %s1011_s19 = smov 0  }
   0x9   :  { %s1013_s20 = smov 0   ;;  %s1015_s21 = smov 0  }
   0xa   :  { %s1017_s22 = smov 0   ;;  %s1019_s23 = smov 0  }
   0xb LB: > { %s659_s24 = sadd.s32 4294967295, %s967_s23   ;;  %s660_s25 = sadd.s32 4294967294, %s967_s23   ;;  %s967_s23 = sphi %s1019_s23, %s26_s23   ;;  %s963_s22 = sphi %s1017_s22, %s1265_s22   ;;  %s959_s21 = sphi %s1015_s21, %s1264_s21   ;;  %s955_s20 = sphi %s1013_s20, %s1263_s20   ;;  %s951_s19 = sphi %s1011_s19, %s1262_s19   ;;  %s947_s18 = sphi %s1009_s18, %s1261_s18  }
   0xc   : > { %p60_p0 = scmp.ne.s32.totalorder %s951_s19, %s947_s18  ;;  %p1043_p1 = scmp.eq.s32.totalorder %s659_s24, 0 }
   0xd   : > { %p1047_p2 = scmp.eq.s32.totalorder %s659_s24, 1  ;;  %p155_p3 = scmp.eq.s32.totalorder %s660_s25, 1 }
   0xe   : > { %p1053_p4 = por %p1043_p1, %p60_p0  ;;  %p661_p5 = scmp.ge.s32.totalorder %s967_s23, 1 }
   0xf   : > { %p1058_p6 = por %p155_p3, %p60_p0  ;;  %p190_p7 = scmp.lt.s32.totalorder %s967_s23, 3 }
  0x10   : > { %s1248_s28 = scalar_select %p1053_p4, 1, 0 }
  0x11   : > { %s1249_s29 = scalar_select %p1058_p6, 1, 0 }
  0x12   : > { %p1063_p8 = pnand %p661_p5, %p190_p7  ;;  %s969_s6 = smov [#allocation5]  }
  0x13   : > { %s208_s7 = sshll.u32 %s969_s6, 4  ;;  %s38_s9 = sadd.s32 1, %s963_s22  ;;  %s209_s7 = int_to_ptr.vmem [resolvable:$true] %s208_s7 }
  0x14   : > { %p723_p9 = pneg %p1063_p8  ;;  %s810_s10 = scalar_lea.vmem %s209_s7, 512 }
  0x15   : > { %p811_p13 = scmp.ne.s32.totalorder %s209_s7, %s810_s10  ;;  %p818_p5 = scmp.lt.s32.totalorder %s209_s7, %s209_s7 }
  0x16   : > { %p1072_p11 = pnand %p723_p9, %p1043_p1  ;;  %p819_p7 = scmp.lt.s32.totalorder %s810_s10, %s810_s10 }
  0x18   : > { %p801_p12 = pneg %p1072_p11  ;;  %p820_p6 = por %p819_p7, %p818_p5 }
  0x1a   : > { %p813_p0 = pnand %p811_p13, %p801_p12 }
  0x1c   : > { %p814_p3 = pneg %p813_p0 }
  0x1e   : > { %p821_p4 = pnand %p820_p6, %p814_p3 }
  0x20   : > { %824 = shalt.err (!%p821_p4)
}
  0x21   : > { %s970_s11 = smov 128   ;;  %s971_s12 = smov 8  }
  0x22   : > { %s1252_s3 = sld [smem:[#allocation15_spill]]  ;;  %p40_p6 = scmp.ge.s32.totalorder %s38_s9, 2 }
  0x23   : > { %s47_s15 = sadd.s32 1, %s955_s20  ;;  %p54_p4 = scmp.ne.s32.totalorder %s955_s20, %s951_s19 }
  0x24   : > { %p55_p9 = scmp.eq.s32.totalorder %s967_s23, 0  ;;  %s1267_s9 = smov (%p40_p6, %s38_s9), 0 }
  0x25   : > { %1253 = sst [smem:[#allocation14_spill]] %s1267_s9  ;;  %p1096_p13 = por %p1047_p2, %p54_p4 }
  0x26   : > { %p1090_p12 = por %p55_p9, %p54_p4  ;;  %s42_s24 = ssub.s32 %s963_s22, %s1267_s9 }
  0x27   : > { %p739_p0 = scmp.lt.s32.totalorder %s967_s23, 2  ;;  %s222_s25 = sand.u32 1, %s955_s20  }
  0x28   : > { %726 = dma.hbm_to_vmem [thread:$0]  (!%p1072_p11), %s1252_s3, 512, %s209_s7, [#allocation6], %s970_s11, %s970_s11, %s971_s12  }
  0x29   : > { %p45_p11 = scmp.eq.s32.totalorder %s42_s24, 0  ;;  %s664_s6 = sshll.u32 %s222_s25, 3 }
  0x2a   : > { %s665_s8 = sshll.u32 %s963_s22, 7  ;;  %s226_s13 = scalar_lea.vmem [#allocation2], %s664_s6 }
  0x2b   : > { %s1105_s7 = scalar_select %p45_p11, %s955_s20, %s47_s15  }
  0x2c   : > { %s232_s12 = scalar_lea.hbm %s1237_s0, %s665_s8  ;;  %s234_s14 = sshll.u32 %s226_s13, 4  ;;  %s235_s14 = int_to_ptr.vmem [resolvable:$true] %s234_s14 }
  0x2d   : > { %p1113_p2 = pnand %p739_p0, %p1090_p12  ;;  %s223_s3 = scalar_lea.sflag [#allocation3], %s222_s25 }
  0x2e   : > { %s838_s24 = scalar_lea.vmem %s235_s14, 128  ;;  %s972_s15 = smov [#allocation2]  }
  0x2f   : > { %p827_p3 = pneg %p1113_p2  ;;  %p839_p5 = scmp.ne.s32.totalorder %s235_s14, %s838_s24 }
  0x30   : > { %s843_s9 = sshll.u32 %s972_s15, 4  ;;  %s844_s9 = int_to_ptr.vmem [resolvable:$false] %s843_s9 }
  0x31   : > { %p841_p7 = pnand %p839_p5, %p827_p3  ;;  %s845_s8 = scalar_lea.vmem %s844_s9, 256 }
  0x32   : > { %p846_p4 = scmp.lt.s32.totalorder %s235_s14, %s844_s9  ;;  %p847_p9 = scmp.lt.s32.totalorder %s845_s8, %s838_s24 }
  0x33   : > { %p842_p6 = pneg %p841_p7 }
  0x34   : > { %p848_p11 = por %p847_p9, %p846_p4 }
  0x36   : > { %p849_p10 = pnand %p848_p11, %p842_p6 }
  0x38   : > { %852 = shalt.err (!%p849_p10)
}
  0x39   : > { %730 = dma.hbm_to_vmem [thread:$0]  (!%p1113_p2), %s232_s12, 128, %s235_s14, %s223_s3  }
  0x3a   : > { %243 = sbr.rel (%p1063_p8) target bundleno = 604 (0x25c), region = 36  ;;  %s1124_s16 = sand.u32 (!%p1063_p8), 1, %s951_s19  }
  0x3b   : > { %s1127_s25 = sshll.u32 (!%p1063_p8), %s1124_s16, 3  ;;  %s246_s9 = scalar_lea.sflag (!%p1063_p8), [#allocation3], %s1124_s16 }
  0x3c   : > { %s249_s6 = scalar_lea.vmem (!%p1063_p8), [#allocation2], %s1127_s25  ;;  %p1257_p12 = scmp.ne.s32.totalorder (!%p1063_p8), %s1248_s28, 0 }
  0x3f   : > { %930 = dma.done.wait (%p1257_p12), %s246_s9, 128  }
  0x40   : > { %932 = vsyncadd (%p1257_p12), %s246_s9, 4294967168 }
  0x41   : > { %934 = dma.done.wait (%p1043_p1), [#allocation6], 512  }
  0x42   : > { %936 = vsyncadd (%p1043_p1), [#allocation6], 4294966784  ;;  %vm288_vm0 = vcmask 261120   ;;  %v285_v0 = vld [vmem:[%s249_s6] sm:$0xff]  ;;  %s973_s3 = smov 96   ;;  %s974_s30 = smov 64  }
  0x43   : > { %v289_v1 = vsel %vm288_vm0, %v285_v0, 0.0  ;;  %v320_v2 = vld [vmem:[#allocation5 + $0x18] sm:$0xff]  ;;  %v413_v3 = vld [vmem:[#allocation5 + $0x10] sm:$0xff]  ;;  %v318_v4 = vld [vmem:[#allocation5 + $0x8] sm:$0xff]  ;;  %v975_v5 = vmov 0.0   ;;  %vm976_vm1 = vmmov 0  }
  0x44   : > { %290 = vadd.xlane.f32.xlu0 %v289_v1  ;;  %331 = vrot.lane.b32.xlu1 %v320_v2, %s973_s3  ;;  %v317_v6 = vld [vmem:[#allocation5] sm:$0xff]  ;;  %v671_v24 = vld [vmem:[%s1238_s1] ss:$0 sm:$0xff]  ;;  %s677_s12 = sshll.u32 %s959_s21, 7  ;;  %s277_s13 = scalar_lea.vmem [#allocation7], %s1127_s25 }
  0x45   : > { %691 = vmatprep.subr.mxu0 %v975_v5  ;;  %702 = vmatprep.subr.mxu1 %v975_v5  ;;  %v672_v26 = vld [vmem:[%s1239_s2] ss:$0 sm:$0xff]  ;;  %s522_s14 = sshll.u32 %s277_s13, 4  ;;  %s284_s27 = scalar_lea.vmem [#allocation8], %s1127_s25  ;;  %s1161_s14 = int_to_ptr.vmem [resolvable:$true] %s522_s14 }
  0x46   : > { %699 = vmatprep.mubr.msk.f32.mxu0 %vm976_vm1, %v975_v5  ;;  %710 = vmatprep.mubr.msk.f32.mxu1 %vm976_vm1, %v975_v5  ;;  %s536_s24 = sshll.u32 %s284_s27, 4  ;;  %s1159_s9 = scalar_lea.hbm %s1241_s4, %s677_s12  ;;  %s1168_s24 = int_to_ptr.vmem [resolvable:$true] %s536_s24 }
  0x47   : > { %s1166_s21 = scalar_lea.hbm %s1242_s5, %s677_s12  ;;  %s503_s25 = scalar_lea.sflag [#allocation4], %s1124_s16 }
  0x48   : > { %425 = vrot.lane.b32.xlu1 %v320_v2, %s974_s30  ;;  %s977_s26 = smov [#allocation7]  }
  0x49   : > { %s857_s28 = sshll.u32 %s977_s26, 4  ;;  %s858_s28 = int_to_ptr.vmem [resolvable:$false] %s857_s28 }
  0x4a   : > { %s859_s10 = scalar_lea.vmem %s858_s28, 256  ;;  %p860_p0 = scmp.lt.s32.totalorder %s1161_s14, %s858_s28 }
  0x4c   : > { %423 = vrot.lane.b32.xlu1 %v413_v3, %s974_s30 }
  0x50   : > { %327 = vrot.lane.b32.xlu1 %v318_v4, %s973_s3 }
  0x54   : > { %421 = vrot.lane.b32.xlu1 %v318_v4, %s974_s30 }
  0x58   : > { %325 = vrot.lane.b32.xlu1 %v317_v6, %s973_s3 }
  0x5c   : > { %419 = vrot.lane.b32.xlu1 %v317_v6, %s974_s30  ;;  %s853_s30 = scalar_lea.vmem %s1161_s14, 128 }
  0x5d   : > { %p854_p1 = scmp.ne.s32.totalorder %s1161_s14, %s853_s30  ;;  %p861_p2 = scmp.lt.s32.totalorder %s859_s10, %s853_s30 }
  0x5f   : > { %p855_p8 = pnand %p854_p1, %p1096_p13  ;;  %p862_p3 = por %p861_p2, %p860_p0 }
  0x61   : > { %p856_p10 = pneg %p855_p8 }
  0x63   : > { %p863_p5 = pnand %p862_p3, %p856_p10 }
  0xb6   : > { %v332_v7 = vpop.permute.xlu1 %331 }
  0xb7   : > { %692 = vmatpush3.msra.mxu0 %v332_v7 }
  0xb8   : > { %693 = vmatprep.subr.mxu0 %v975_v5 }
  0xba   : > { %v426_v13 = vpop.permute.xlu1 %425 }
  0xbb   : > { %703 = vmatpush3.msra.mxu1 %v426_v13 }
  0xbc   : > { %704 = vmatprep.subr.mxu1 %v975_v5 }
  0xbe   : > { %v424_v14 = vpop.permute.xlu1 %423 }
  0xbf   : > { %705 = vmatpush3.msra.mxu1 %v424_v14 }
  0xc0   : > { %706 = vmatprep.subr.mxu1 %v975_v5 }
  0xc2   : > { %v328_v15 = vpop.permute.xlu1 %327 }
  0xc6   : > { %v422_v16 = vpop.permute.xlu1 %421 }
  0xc7   : > { %707 = vmatpush3.msra.mxu1 %v422_v16 }
  0xc8   : > { %708 = vmatprep.subr.mxu1 %v975_v5 }
  0xca   : > { %v326_v17 = vpop.permute.xlu1 %325 }
  0xcd   : > { %v291_v8 = vpop.xlane.xlu0 %290 }
  0xce   : > { %v293_v9 = vmul.f32 0.03125, %v291_v8  ;;  %v420_v18 = vpop.permute.xlu1 %419 }
  0xcf   : > { %709 = vmatpush3.msra.mxu1 %v420_v18 }
  0xd0   : > { %v294_v10 = vsub.f32 %v285_v0, %v293_v9 }
  0xd2   : > { %v295_v11 = vmul.f32 %v294_v10, %v294_v10 }
  0xd4   : > { %v296_v12 = vsel %vm288_vm0, %v295_v11, 0.0 }
  0xd5   : > { %297 = vadd.xlane.f32.xlu0 %v296_v12 }
  0xeb   : > { %329 = vrot.lane.b32.xlu0 %v413_v3, %s973_s3 }
 0x15e   : > { %v298_v19 = vpop.xlane.xlu0 %297 }
 0x15f   : > { %v299_v20 = vmul.f32 0.03125, %v298_v19 }
 0x161   : > { %v300_v21 = vadd.f32 1e-05, %v299_v20 }
 0x162   : > { %v330_v22 = vpop.permute.xlu0 %329 }
 0x163   : > { %797 = vrsqrt.f32 %v300_v21  ;;  %694 = vmatpush3.msra.mxu0 %v330_v22 }
 0x164   : > { %695 = vmatprep.subr.mxu0 %v975_v5 }
 0x165   : > { %696 = vmatpush3.msra.mxu0 %v328_v15 }
 0x166   : > { %697 = vmatprep.subr.mxu0 %v975_v5 }
 0x167   : > { %698 = vmatpush3.msra.mxu0 %v326_v17 }
 0x170   : > { %v798_v23 = vpop.eup %797 }
 0x171   : > { %v302_v25 = vmul.f32 %v798_v23, %v294_v10 }
 0x173   : > { %v309_v27 = vmul.f32 %v671_v24, %v302_v25 }
 0x175   : > { %v316_v28 = vadd.f32 %v672_v26, %v309_v27 }
 0x177   : > { %700 = vmatmul.mubr.msk.f32.vlgmr.msra.gmra.mxu0 %vm288_vm0, %v316_v28  ;;  %711 = vmatmul.mubr.msk.f32.vlgmr.msra.gmra.mxu1 %vm288_vm0, %v316_v28 }
 0x237   : > { %v406_v29 = vpop.f32.mrf.mxu0  ;;  %v497_v30 = vpop.f32.mrf.mxu1 }
 0x238   : > { %410 = vst.msk [vmem:[%s277_s13] sm:$0xff] %vm288_vm0, %v406_v29  ;;  %501 = vst.msk [vmem:[%s284_s27] sm:$0xff] %vm288_vm0, %v497_v30 }
 0x239   : > { %v701_v31 = vpop.f32.mrf.mxu0  ;;  %v712_v32 = vpop.f32.mrf.mxu1 }
 0x23a   : > { %866 = shalt.err (!%p863_p5)
}
 0x23b   : > { %s867_s11 = scalar_lea.hbm %s1159_s9, 128  ;;  %s871_s27 = scalar_lea.hbm %s1241_s4, 256 }
 0x23c   : > { %p868_p7 = scmp.ne.s32.totalorder %s1159_s9, %s867_s11  ;;  %p872_p9 = scmp.lt.s32.totalorder %s1159_s9, %s1241_s4 }
 0x23d   : > { %p873_p11 = scmp.lt.s32.totalorder %s871_s27, %s867_s11 }
 0x23e   : > { %p869_p6 = pnand %p868_p7, %p1096_p13 }
 0x23f   : > { %p874_p12 = por %p873_p11, %p872_p9 }
 0x240   : > { %p870_p4 = pneg %p869_p6 }
 0x242   : > { %p875_p1 = pnand %p874_p12, %p870_p4 }
 0x244   : > { %878 = shalt.err (!%p875_p1)
}
 0x245   : > { %719 = dma.vmem_to_hbm [thread:$0]  (%p1096_p13), %s1161_s14, 128, %s1159_s9, %s503_s25  }
 0x246   : > { %s508_s6 = scalar_lea.sflag [#allocation9], %s1124_s16  ;;  %s879_s3 = scalar_lea.vmem %s1168_s24, 128 }
 0x247   : > { %p880_p8 = scmp.ne.s32.totalorder %s1168_s24, %s879_s3  ;;  %s978_s30 = smov [#allocation8]  }
 0x248   : > { %s883_s26 = sshll.u32 %s978_s30, 4  ;;  %s884_s26 = int_to_ptr.vmem [resolvable:$false] %s883_s26 }
 0x249   : > { %p881_p10 = pnand %p880_p8, %p1096_p13  ;;  %s885_s28 = scalar_lea.vmem %s884_s26, 256 }
 0x24a   : > { %p886_p2 = scmp.lt.s32.totalorder %s1168_s24, %s884_s26  ;;  %p887_p3 = scmp.lt.s32.totalorder %s885_s28, %s879_s3 }
 0x24b   : > { %p882_p0 = pneg %p881_p10 }
 0x24c   : > { %p888_p5 = por %p887_p3, %p886_p2 }
 0x24e   : > { %p889_p7 = pnand %p888_p5, %p882_p0 }
 0x250   : > { %892 = shalt.err (!%p889_p7)
}
 0x251   : > { %s893_s14 = scalar_lea.hbm %s1166_s21, 128  ;;  %s897_s25 = scalar_lea.hbm %s1242_s5, 256 }
 0x252   : > { %p894_p6 = scmp.ne.s32.totalorder %s1166_s21, %s893_s14  ;;  %p898_p11 = scmp.lt.s32.totalorder %s1166_s21, %s1242_s5 }
 0x253   : > { %p899_p12 = scmp.lt.s32.totalorder %s897_s25, %s893_s14 }
 0x254   : > { %p895_p4 = pnand %p894_p6, %p1096_p13 }
 0x255   : > { %p900_p1 = por %p899_p12, %p898_p11 }
 0x256   : > { %p896_p9 = pneg %p895_p4 }
 0x258   : > { %p901_p8 = pnand %p900_p1, %p896_p9 }
 0x25a   : > { %904 = shalt.err (!%p901_p8)
}
 0x25b   : > { %720 = dma.vmem_to_hbm [thread:$0]  (%p1096_p13), %s1168_s24, 128, %s1166_s21, %s508_s6  }
 0x25c PF: > { %s548_s12 = sand.u32 1, %s947_s18   ;;  %p1258_p10 = scmp.ne.s32.totalorder %s1249_s29, 0 }
 0x25d   : > { %p1259_p0 = scmp.ge.s32.totalorder %s967_s23, 2  ;;  %s549_s13 = scalar_lea.sflag [#allocation4], %s548_s12 }
 0x25f   : > { %p732_p2 = pnand %p1259_p0, %p1258_p10 }
 0x261   : > { %p733_p3 = pneg %p732_p2 }
 0x263   : > { %938 = dma.done.wait (%p733_p3), %s549_s13, 128  }
 0x264   : > { %940 = vsyncadd (%p733_p3), %s549_s13, 4294967168  ;;  %s558_s27 = scalar_lea.sflag [#allocation9], %s548_s12 }
 0x265   : > { %942 = dma.done.wait (%p733_p3), %s558_s27, 128  }
 0x266   : > { %944 = vsyncadd (%p733_p3), %s558_s27, 4294967168  ;;  %s26_s23 = sadd.s32 1, %s967_s23   ;;  %s1260_s17 = sld [smem:[#allocation14_spill]] }
 0x267   : > { %p23_p5 = scmp.ge.s32.totalorder %s26_s23, 4   ;;  %s1261_s18 = smov %s951_s19 }
 0x268   : > { %s1262_s19 = smov %s955_s20  ;;  %s1263_s20 = smov %s1105_s7 }
 0x269   : > { %s1264_s21 = smov %s963_s22  ;;  %25 = sbr.rel (!%p23_p5) target bundleno = 11 (0xb), region = 102 }
 0x26c   : > { %s1265_s22 = smov %s1260_s17 }
 0x26e   :  { %563 = vsyncpa [#allocation3], 1 }
 0x26f   :  { %565 = vsyncpa [#allocation3 + $0x1], 1 }
 0x270   :  { %566 = vsyncpa [#allocation6], 1 }
 0x271   :  { %567 = vsyncpa [#allocation4], 1 }
 0x272   :  { %569 = vsyncpa [#allocation4 + $0x1], 1 }
 0x273   :  { %570 = vsyncpa [#allocation9], 1 }
 0x274   :  { %572 = vsyncpa [#allocation9 + $0x1], 1 }

</bundles_post_ra>
